<compile_context>
chip_gen: v6e
topology: v6e:2x2x1
jax: 0.10.0
libtpu: 0.0.40
codegen_flags: <defaults>
</compile_context>

<pallas_src>
import functools

import jax
import jax.numpy as jnp
from jax.experimental import pallas as pl
from jax.experimental.pallas import tpu as pltpu

BN_EPS = 1e-5
BN_MOMENTUM = 0.01   # module uses momentum = 1 - 0.99


def _bn_train_kernel(x_ref, p_ref, y_ref, p_out_ref, *, N, C, HW):
    """x_ref: (N*C, HW) f32 (sublane/lane dense).
    p_ref / p_out_ref: (4*C, 1) f32 packed as [gamma; beta; running_mean; running_var]."""
    x = x_ref[...]                                        # (N*C, HW)

    # --- single sweep over x: per-row sum and sum-of-squares (lane/XLU reductions) ---
    row_sum = jnp.sum(x, axis=1, keepdims=True)           # (N*C, 1)
    row_sq = jnp.sum(x * x, axis=1, keepdims=True)        # (N*C, 1)

    # Fold the N batch groups of the tiny column together -> per-channel sums (C, 1).
    ch_sum, ch_sq = row_sum[0:C], row_sq[0:C]
    for i in range(1, N):
        ch_sum = ch_sum + row_sum[i * C:(i + 1) * C]
        ch_sq = ch_sq + row_sq[i * C:(i + 1) * C]

    n_red = N * HW
    inv_n = 1.0 / n_red
    mu = ch_sum * inv_n                                   # (C, 1)
    var = ch_sq * inv_n - mu * mu                         # biased batch variance (f32 accum)

    gamma = p_ref[0 * C:1 * C]                            # (C, 1) static sublane slices
    beta = p_ref[1 * C:2 * C]
    rmean = p_ref[2 * C:3 * C]
    rvar = p_ref[3 * C:4 * C]

    # Fold normalize + affine into one per-element FMA: y = x * scale + shift.
    scale = gamma * jax.lax.rsqrt(var + BN_EPS)           # (C, 1)
    shift = beta - mu * scale                             # (C, 1)
    scale_rows = jnp.concatenate([scale] * N, axis=0)     # (N*C, 1), broadcasts over lanes
    shift_rows = jnp.concatenate([shift] * N, axis=0)
    y_ref[...] = x * scale_rows + shift_rows              # dense, unmasked store

    # Running-statistics update (PyTorch uses the *unbiased* batch variance here).
    bessel = n_red / (n_red - 1) if n_red > 1 else 1.0    # guard degenerate N*H*W == 1
    new_rmean = (1.0 - BN_MOMENTUM) * rmean + BN_MOMENTUM * mu
    new_rvar = (1.0 - BN_MOMENTUM) * rvar + BN_MOMENTUM * var * bessel
    p_out_ref[...] = jnp.concatenate([gamma, beta, new_rmean, new_rvar], axis=0)
    # TODO(synk): num_batches_tracked counter of nn.BatchNorm2d is not tracked (no effect on output).


@jax.jit
def batchnorm2d_train(x_nchw, gamma, beta, running_mean, running_var):
    """Forward of BatchNormalization2D in training mode.

    Returns (y, new_running_mean, new_running_var); y matches the PyTorch forward output,
    the running stats are the updated buffer values (returned functionally).
    """
    N, C, H, W = x_nchw.shape
    HW = H * W

    # (N*C, H*W) = (8, 256): free contiguous reshape from NCHW, exactly fills the (8,128) tile.
    xr = x_nchw.astype(jnp.float32).reshape(N * C, HW)
    # Pack the four per-channel parameter vectors into ONE (4*C, 1) column -> one DMA in/out.
    params = jnp.concatenate([gamma, beta, running_mean, running_var]).astype(jnp.float32)
    params = params.reshape(4 * C, 1)

    vmem = pl.BlockSpec(memory_space=pltpu.MemorySpace.VMEM)
    kernel = functools.partial(_bn_train_kernel, N=N, C=C, HW=HW)
    y2d, new_params = pl.pallas_call(
        kernel,
        out_shape=(jax.ShapeDtypeStruct((N * C, HW), jnp.float32),
                   jax.ShapeDtypeStruct((4 * C, 1), jnp.float32)),
        in_specs=(vmem, vmem),
        out_specs=(vmem, vmem),
        # Update the packed parameter/stat buffer in place (mirrors BatchNorm2d buffer mutation).
        input_output_aliases={1: 1},
    )(xr, params)

    y = y2d.reshape(N, C, H, W)
    new_rmean = new_params[2 * C:3 * C, 0]
    new_rvar = new_params[3 * C:4 * C, 0]
    return y, new_rmean, new_rvar


def reference(x, gamma, beta, running_mean, running_var):
    """Pure-JAX mirror of nn.BatchNorm2d(training=True, momentum=0.01, eps=1e-5)."""
    n = x.shape[0] * x.shape[2] * x.shape[3]
    mu = jnp.mean(x, axis=(0, 2, 3))
    xc = x - mu[None, :, None, None]
    var = jnp.mean(xc * xc, axis=(0, 2, 3))
    y = (xc * jax.lax.rsqrt(var + BN_EPS)[None, :, None, None]
         * gamma[None, :, None, None] + beta[None, :, None, None])
    new_rm = (1.0 - BN_MOMENTUM) * running_mean + BN_MOMENTUM * mu
    new_rv = (1.0 - BN_MOMENTUM) * running_var + BN_MOMENTUM * var * (n / (n - 1))
    return y, new_rm, new_rv


if __name__ == "__main__":
    N, C, H, W = 2, 4, 16, 16          # numFeatures = 4

    key = jax.random.PRNGKey(0)
    kx, kg, kb, km, kv = jax.random.split(key, 5)
    x = jax.random.normal(kx, (N, C, H, W), jnp.float32)
    gamma = 1.0 + 0.1 * jax.random.normal(kg, (C,), jnp.float32)
    beta = 0.1 * jax.random.normal(kb, (C,), jnp.float32)
    running_mean = 0.05 * jax.random.normal(km, (C,), jnp.float32)
    running_var = 1.0 + 0.1 * jnp.abs(jax.random.normal(kv, (C,), jnp.float32))

    y, new_rm, new_rv = batchnorm2d_train(x, gamma, beta, running_mean, running_var)
    y = jax.block_until_ready(y)

    y_ref, rm_ref, rv_ref = reference(x, gamma, beta, running_mean, running_var)
    assert y.shape == (N, C, H, W), y.shape
    assert jnp.allclose(y, y_ref, atol=1e-5, rtol=1e-5), \
        f"max abs err (y) = {float(jnp.max(jnp.abs(y - y_ref)))}"
    assert jnp.allclose(new_rm, rm_ref, atol=1e-6, rtol=1e-6), \
        f"max abs err (running_mean) = {float(jnp.max(jnp.abs(new_rm - rm_ref)))}"
    assert jnp.allclose(new_rv, rv_ref, atol=1e-6, rtol=1e-6), \
        f"max abs err (running_var) = {float(jnp.max(jnp.abs(new_rv - rv_ref)))}"

    print("KERNEL_OK")
</pallas_src>

<mosaic_0001>
module attributes {stable_mosaic.version = 11 : i64} {
  func.func @_bn_train_kernel(%arg0: memref<8x256xf32, #tpu.memory_space<vmem>>, %arg1: memref<16x1xf32, #tpu.memory_space<vmem>>, %arg2: memref<8x256xf32, #tpu.memory_space<vmem>>, %arg3: memref<16x1xf32, #tpu.memory_space<vmem>>) attributes {dimension_semantics = [], scalar_prefetch = 0 : i64, scratch_operands = 0 : i64, tpu.core_type = #tpu.core_type<tc>} {
    %c0 = arith.constant 0 : index
    %c0_0 = arith.constant 0 : index
    %0 = vector.load %arg0[%c0, %c0_0] : memref<8x256xf32, #tpu.memory_space<vmem>>, vector<8x256xf32>
    %cst = arith.constant dense<0.000000e+00> : vector<8xf32>
    %1 = vector.multi_reduction <add>, %0, %cst [1] : vector<8x256xf32> to vector<8xf32>
    %2 = vector.shape_cast %1 : vector<8xf32> to vector<8x1xf32>
    %3 = arith.mulf %0, %0 : vector<8x256xf32>
    %cst_1 = arith.constant dense<0.000000e+00> : vector<8xf32>
    %4 = vector.multi_reduction <add>, %3, %cst_1 [1] : vector<8x256xf32> to vector<8xf32>
    %5 = vector.shape_cast %4 : vector<8xf32> to vector<8x1xf32>
    %6 = vector.extract_strided_slice %2 {offsets = [0, 0], sizes = [4, 1], strides = [1, 1]} : vector<8x1xf32> to vector<4x1xf32>
    %7 = vector.extract_strided_slice %5 {offsets = [0, 0], sizes = [4, 1], strides = [1, 1]} : vector<8x1xf32> to vector<4x1xf32>
    %8 = vector.extract_strided_slice %2 {offsets = [4, 0], sizes = [4, 1], strides = [1, 1]} : vector<8x1xf32> to vector<4x1xf32>
    %9 = arith.addf %6, %8 : vector<4x1xf32>
    %10 = vector.extract_strided_slice %5 {offsets = [4, 0], sizes = [4, 1], strides = [1, 1]} : vector<8x1xf32> to vector<4x1xf32>
    %11 = arith.addf %7, %10 : vector<4x1xf32>
    %cst_2 = arith.constant 0.001953125 : f32
    %12 = vector.broadcast %cst_2 : f32 to vector<4x1xf32>
    %13 = arith.mulf %9, %12 : vector<4x1xf32>
    %cst_3 = arith.constant 0.001953125 : f32
    %14 = vector.broadcast %cst_3 : f32 to vector<4x1xf32>
    %15 = arith.mulf %11, %14 : vector<4x1xf32>
    %16 = arith.mulf %13, %13 : vector<4x1xf32>
    %17 = arith.subf %15, %16 : vector<4x1xf32>
    %c0_4 = arith.constant 0 : index
    %c0_5 = arith.constant 0 : index
    %18 = vector.load %arg1[%c0_4, %c0_5] : memref<16x1xf32, #tpu.memory_space<vmem>>, vector<4x1xf32>
    %c4 = arith.constant 4 : index
    %c0_6 = arith.constant 0 : index
    %19 = vector.load %arg1[%c4, %c0_6] : memref<16x1xf32, #tpu.memory_space<vmem>>, vector<4x1xf32>
    %c8 = arith.constant 8 : index
    %c0_7 = arith.constant 0 : index
    %20 = vector.load %arg1[%c8, %c0_7] : memref<16x1xf32, #tpu.memory_space<vmem>>, vector<4x1xf32>
    %c12 = arith.constant 12 : index
    %c0_8 = arith.constant 0 : index
    %21 = vector.load %arg1[%c12, %c0_8] : memref<16x1xf32, #tpu.memory_space<vmem>>, vector<4x1xf32>
    %cst_9 = arith.constant 9.99999974E-6 : f32
    %22 = vector.broadcast %cst_9 : f32 to vector<4x1xf32>
    %23 = arith.addf %17, %22 : vector<4x1xf32>
    %24 = math.rsqrt %23 : vector<4x1xf32>
    %25 = arith.mulf %18, %24 : vector<4x1xf32>
    %26 = arith.mulf %13, %25 : vector<4x1xf32>
    %27 = arith.subf %19, %26 : vector<4x1xf32>
    %28 = tpu.concatenate %25, %25 in 0 : vector<4x1xf32>, vector<4x1xf32> -> vector<8x1xf32>
    %29 = tpu.concatenate %27, %27 in 0 : vector<4x1xf32>, vector<4x1xf32> -> vector<8x1xf32>
    %30 = vector.broadcast %28 : vector<8x1xf32> to vector<8x256xf32>
    %31 = arith.mulf %0, %30 : vector<8x256xf32>
    %32 = vector.broadcast %29 : vector<8x1xf32> to vector<8x256xf32>
    %33 = arith.addf %31, %32 : vector<8x256xf32>
    %c0_10 = arith.constant 0 : index
    %c0_11 = arith.constant 0 : index
    %34 = vector.load %arg2[%c0_10, %c0_11] : memref<8x256xf32, #tpu.memory_space<vmem>>, vector<8x256xf32>
    tpu.vector_store %arg2[%c0_10, %c0_11], %33 {strides = array<i32>} : memref<8x256xf32, #tpu.memory_space<vmem>>, vector<8x256xf32>,
    %cst_12 = arith.constant 9.900000e-01 : f32
    %35 = vector.broadcast %cst_12 : f32 to vector<4x1xf32>
    %36 = arith.mulf %35, %20 : vector<4x1xf32>
    %cst_13 = arith.constant 0.00999999977 : f32
    %37 = vector.broadcast %cst_13 : f32 to vector<4x1xf32>
    %38 = arith.mulf %37, %13 : vector<4x1xf32>
    %39 = arith.addf %36, %38 : vector<4x1xf32>
    %cst_14 = arith.constant 9.900000e-01 : f32
    %40 = vector.broadcast %cst_14 : f32 to vector<4x1xf32>
    %41 = arith.mulf %40, %21 : vector<4x1xf32>
    %cst_15 = arith.constant 0.00999999977 : f32
    %42 = vector.broadcast %cst_15 : f32 to vector<4x1xf32>
    %43 = arith.mulf %42, %17 : vector<4x1xf32>
    %cst_16 = arith.constant 1.00195694 : f32
    %44 = vector.broadcast %cst_16 : f32 to vector<4x1xf32>
    %45 = arith.mulf %43, %44 : vector<4x1xf32>
    %46 = arith.addf %41, %45 : vector<4x1xf32>
    %47 = tpu.concatenate %18, %19, %39, %46 in 0 : vector<4x1xf32>, vector<4x1xf32>, vector<4x1xf32>, vector<4x1xf32> -> vector<16x1xf32>
    %c0_17 = arith.constant 0 : index
    %c0_18 = arith.constant 0 : index
    %48 = vector.load %arg3[%c0_17, %c0_18] : memref<16x1xf32, #tpu.memory_space<vmem>>, vector<16x1xf32>
    tpu.vector_store %arg3[%c0_17, %c0_18], %47 {strides = array<i32>} : memref<16x1xf32, #tpu.memory_space<vmem>>, vector<16x1xf32>,
    return
  }
}

</mosaic_0001>

<bundles_post_ra>
// kernel: batchnorm2d_train.1
= control target key start
LH: loop header
LB: loop body
LE: loop exit
PB: predicated region body
PF: predicated region fallthrough
CT: control target
= control target key end

     0   :  { %v100_v6 = vmov 0   ;;  %vm47_vm0 = vcmask 1043456   ;;  %vm84_vm1 = vcmask 7168   ;;  %s157_s0 = inlined_call_operand.vmem [shape: f32[8,256], index: 0, kind: input, shape index: {}]   ;;  %s158_s1 = inlined_call_operand.vmem [shape: f32[16,1], index: 1, kind: input, shape index: {}, may-alias: {1,3}]   ;;  %s159_s3 = inlined_call_operand.vmem [shape: f32[16,1], index: 3, kind: output, shape index: {1}, may-alias: {1,3}]   ;;  %s160_s2 = inlined_call_operand.vmem [shape: f32[8,256], index: 2, kind: output, shape index: {0}]  }
   0x1   :  { %v13_v0 = vld [vmem:[%s157_s0] sm:$0xff]  ;;  %v14_v1 = vld [vmem:[%s157_s0 + $0x8] sm:$0xff]  ;;  %96 = vset.pattern.permute.xlu1 %v100_v6  ;;  %97 = vset.pattern.permute.xlu0 %v100_v6 }
   0x2   :  { %v15_v2 = vadd.f32 %v14_v1, %v13_v0  ;;  %v18_v3 = vmul.f32 %v13_v0, %v13_v0  ;;  %v19_v4 = vmul.f32 %v14_v1, %v14_v1  ;;  %v36_v7 = vld [vmem:[%s158_s1 + $0x4] sm:$0xf]  ;;  %v35_v9 = vld [vmem:[%s158_s1] sm:$0xf] }
   0x3   :  { %v77_v8 = vrot.slane %v36_v7, 4 }
   0x4   :  { %16 = vadd.xlane.f32.xlu0 %v15_v2  ;;  %v20_v5 = vadd.f32 %v19_v4, %v18_v3 }
   0x5   :  { %v82_v10 = vsel %vm47_vm0, %v35_v9, %v77_v8 }
   0x6   :  { %85 = vst.msk [vmem:[%s159_s3] sm:$0xff] %vm84_vm1, %v82_v10 }
   0x8   :  { %21 = vadd.xlane.f32.xlu0 %v20_v5 }
   0xd   :  { %v38_v20 = vld [vmem:[%s158_s1 + $0xc] sm:$0xf]  ;;  %v37_v22 = vld [vmem:[%s158_s1 + $0x8] sm:$0xf] }
   0xe   :  { %v72_v23 = vmul.f32 0.99, %v38_v20  ;;  %v69_v26 = vmul.f32 0.99, %v37_v22 }
  0x8d   :  { %v17_v11 = vpop.xlane.xlu0 %16 }
  0x8e   :  { %v24_v12 = vrot.slane %v17_v11, 4 }
  0x90   :  { %v26_v13 = vadd.f32 %v24_v12, %v17_v11 }
  0x91   :  { %v22_v14 = vpop.xlane.xlu0 %21 }
  0x92   :  { %v31_v15 = vmul.f32 0.001953125, %v26_v13  ;;  %v28_v16 = vrot.slane %v22_v14, 4 }
  0x94   :  { %v30_v17 = vadd.f32 %v28_v16, %v22_v14  ;;  %v33_v18 = vmul.f32 %v31_v15, %v31_v15  ;;  %v70_v27 = vmul.f32 0.01, %v31_v15 }
  0x96   :  { %v32_v19 = vmul.f32 0.001953125, %v30_v17  ;;  %v71_v30 = vadd.f32 %v70_v27, %v69_v26 }
  0x98   :  { %v34_v21 = vsub.f32 %v32_v19, %v33_v18 }
  0x9a   :  { %v39_v24 = vadd.f32 1e-05, %v34_v21  ;;  %v73_v25 = vmul.f32 0.01, %v34_v21 }
  0x9c   :  { %98 = vrsqrt.f32 %v39_v24  ;;  %v74_v28 = vmul.f32 1.0019569, %v73_v25 }
  0x9e   :  { %v75_v29 = vadd.f32 %v74_v28, %v72_v23 }
  0xa0   :  { %v80_v31 = vrot.slane %v75_v29, 4 }
  0xa2   :  { %v83_v32 = vsel %vm47_vm0, %v71_v30, %v80_v31 }
  0xa3   :  { %86 = vst.msk [vmem:[%s159_s3 + $0x8] sm:$0xff] %vm84_vm1, %v83_v32 }
  0xa9   :  { %v99_v33 = vpop.eup %98 }
  0xaa   :  { %v41_v34 = vmul.f32 %v99_v33, %v35_v9 }
  0xac   :  { %v45_v35 = vrot.slane %v41_v34, 4  ;;  %v42_v36 = vmul.f32 %v41_v34, %v31_v15 }
  0xae   :  { %v48_v37 = vsel %vm47_vm0, %v41_v34, %v45_v35  ;;  %v43_v38 = vsub.f32 %v36_v7, %v42_v36 }
  0xaf   :  { %55 = vperm.xlu1 %96, %v48_v37  }
  0xb0   :  { %v50_v39 = vrot.slane %v43_v38, 4 }
  0xb2   :  { %v52_v40 = vsel %vm47_vm0, %v43_v38, %v50_v39 }
  0xb3   :  { %62 = vperm.xlu1 %96, %v52_v40  }
 0x12a   :  { %v56_v41 = vpop.permute.xlu1 %55 }
 0x12b   :  { %v58_v42 = vmul.f32 %v56_v41, %v13_v0  ;;  %v59_v43 = vmul.f32 %v56_v41, %v14_v1 }
 0x12e   :  { %v63_v44 = vpop.permute.xlu1 %62 }
 0x12f   :  { %v65_v45 = vadd.f32 %v63_v44, %v58_v42  ;;  %v66_v46 = vadd.f32 %v63_v44, %v59_v43 }
 0x131   :  { %67 = vst [vmem:[%s160_s2] sm:$0xff] %v65_v45  ;;  %68 = vst [vmem:[%s160_s2 + $0x8] sm:$0xff] %v66_v46 }

</bundles_post_ra>
